<compile_context>
chip_gen: v6e
topology: v6e:2x2x1
jax: 0.10.0
libtpu: 0.0.40
codegen_flags: <defaults>
</compile_context>

<pallas_src>
import functools

import jax
import jax.numpy as jnp
from jax.experimental import pallas as pl
from jax.experimental.pallas import tpu as pltpu


# --------------------------------- kernel ---------------------------------

def _tcn_kernel(x_ref, *refs, layer_cfg, K, S, L, p_max):
    """Fused TCN stack for one batch tile.

    x_ref:  (C0, NS) input, flat segments: [p_max zeros | L data | tail zeros]
    refs:   per-layer weight refs (w1, b1, w2, b2[, wd, bd]) ... then o_ref
    o_ref:  (C_last, NS) output in the same flat segment layout
    """
    o_ref = refs[-1]
    w_refs = refs[:-1]
    NS = x_ref.shape[-1]

    # Validity mask: within each length-S segment only lanes [p_max, p_max+L)
    # carry real time steps; everything else is causal/tail padding kept at 0.
    pos = jax.lax.broadcasted_iota(jnp.int32, (1, NS), 1) % S
    valid = jnp.logical_and(pos >= p_max, pos < p_max + L)

    def dilated_conv(x_f32, x_bf16, w_ref, b_ref, d):
        # Causal dilated conv: y[q] = sum_i W[i] @ x[q - (K-1-i)*d].
        # Tap i = K-1 has zero shift -> reuse the pre-cast bf16 activation.
        acc = jnp.dot(w_ref[K - 1], x_bf16, preferred_element_type=jnp.float32)
        for i in range(K - 1):                   # static taps, static shifts
            s = (K - 1 - i) * d
            xs = pltpu.roll(x_f32, shift=s, axis=1).astype(jnp.bfloat16)
            acc = acc + jnp.dot(w_ref[i], xs, preferred_element_type=jnp.float32)
        return acc + b_ref[...]

    x = x_ref[...].astype(jnp.float32)
    idx = 0
    for d, has_down in layer_cfg:                # static layer unroll
        w1, b1, w2, b2 = w_refs[idx:idx + 4]
        idx += 4
        xb = x.astype(jnp.bfloat16)              # shared by conv1 tap-0 & downsample

        # conv1 + chomp + ReLU (dropout = identity); re-zero padding lanes so
        # they remain valid causal zeros for conv2.
        h = jnp.where(valid, jnp.maximum(dilated_conv(x, xb, w1, b1, d), 0.0), 0.0)
        hb = h.astype(jnp.bfloat16)
        # conv2 + chomp + ReLU
        out = jnp.maximum(dilated_conv(h, hb, w2, b2, d), 0.0)

        # residual branch
        if has_down:
            wd, bd = w_refs[idx:idx + 2]
            idx += 2
            res = jnp.dot(wd[...], xb, preferred_element_type=jnp.float32) + bd[...]
        else:
            res = x

        x = jnp.where(valid, jnp.maximum(out + res, 0.0), 0.0)

    o_ref[...] = x.astype(o_ref.dtype)


# --------------------------------- wrapper ---------------------------------

def _round_up(a, b):
    return (a + b - 1) // b * b


def temporal_conv_net(x, params, *, kernel_size, batch_tile=None):
    """TemporalConvNet forward. x: (N, C_in, L) -> (N, C_out_last, L)."""
    N, C0, L = x.shape
    K = kernel_size
    num_layers = len(params)
    p_max = (K - 1) * (2 ** (num_layers - 1))    # largest causal pad in stack
    S = _round_up(L + p_max, 128)                # lane-dense per-batch segment

    if batch_tile is None:
        batch_tile = N // 2 if (N % 2 == 0 and N > 1) else N
    assert N % batch_tile == 0, "batch must divide evenly into batch tiles"
    num_tiles = N // batch_tile
    NS = batch_tile * S

    # (N, C, L) -> (C, N*S): each segment is [p_max zeros | L data | tail zeros]
    xp = jnp.pad(x, ((0, 0), (0, 0), (p_max, S - L - p_max)))
    xf = jnp.transpose(xp, (1, 0, 2)).reshape(C0, N * S)

    def const_spec(shape):
        zeros = (0,) * len(shape)
        return pl.BlockSpec(shape, lambda n, _z=zeros: _z)

    layer_cfg = []
    w_args, w_specs = [], []
    c_out = C0
    for i, (w1, b1, w2, b2, wd, bd) in enumerate(params):
        d = 2 ** i
        has_down = wd is not None
        layer_cfg.append((d, has_down))
        ops = [w1.astype(jnp.bfloat16), b1.astype(jnp.float32),
               w2.astype(jnp.bfloat16), b2.astype(jnp.float32)]
        if has_down:
            ops += [wd.astype(jnp.bfloat16), bd.astype(jnp.float32)]
        w_args += ops
        w_specs += [const_spec(o.shape) for o in ops]
        c_out = w1.shape[1]

    kernel = functools.partial(_tcn_kernel, layer_cfg=tuple(layer_cfg),
                               K=K, S=S, L=L, p_max=p_max)

    # TODO(synk): at production sizes (large L / deep stacks) tile the time
    # axis with a p_max halo and set vmem_limit_bytes for v7x's 64 MiB VMEM.
    of = pl.pallas_call(
        kernel,
        out_shape=jax.ShapeDtypeStruct((c_out, N * S), x.dtype),
        grid=(num_tiles,),
        in_specs=[pl.BlockSpec((C0, NS), lambda n: (0, n))] + w_specs,
        out_specs=pl.BlockSpec((c_out, NS), lambda n: (0, n)),
        compiler_params=pltpu.CompilerParams(
            dimension_semantics=("parallel",)),
    )(xf, *w_args)

    # (C, N*S) -> (N, C, L): drop causal/tail padding lanes.
    return of.reshape(c_out, N, S).transpose(1, 0, 2)[:, :, p_max:p_max + L]


# ------------------------- parameter construction -------------------------

def _weight_norm_weight(kv, kg, cout, cin, K):
    """Effective Conv1d weight under weight_norm (dim=0): w = g * v/||v||."""
    v = 0.01 * jax.random.normal(kv, (cout, cin, K), jnp.float32)
    g = jax.random.uniform(kg, (cout, 1, 1), jnp.float32, minval=0.5, maxval=1.5)
    w = g * v / jnp.sqrt(jnp.sum(v * v, axis=(1, 2), keepdims=True) + 1e-12)
    return jnp.transpose(w, (2, 0, 1))           # (K, Cout, Cin)


def init_tcn_params(key, num_inputs, num_channels, kernel_size):
    params = []
    for i, out_ch in enumerate(num_channels):
        in_ch = num_inputs if i == 0 else num_channels[i - 1]
        key, k1, k2, k3, k4, k5, k6, k7, k8 = jax.random.split(key, 9)
        w1 = _weight_norm_weight(k1, k2, out_ch, in_ch, kernel_size)
        b1 = 0.05 * jax.random.normal(k3, (out_ch, 1), jnp.float32)
        w2 = _weight_norm_weight(k4, k5, out_ch, out_ch, kernel_size)
        b2 = 0.05 * jax.random.normal(k6, (out_ch, 1), jnp.float32)
        if in_ch != out_ch:
            wd = 0.01 * jax.random.normal(k7, (out_ch, in_ch), jnp.float32)
            bd = 0.05 * jax.random.normal(k8, (out_ch, 1), jnp.float32)
        else:
            wd, bd = None, None
        params.append((w1, b1, w2, b2, wd, bd))
    return params


# ----------------------------- pure-JAX reference -----------------------------

def _ref_block(x, block_params, K, d):
    w1, b1, w2, b2, wd, bd = block_params
    p = (K - 1) * d

    def conv(inp, w_kio, b):
        w = jnp.transpose(w_kio, (1, 2, 0))      # (Cout, Cin, K)
        y = jax.lax.conv_general_dilated(
            inp, w, window_strides=(1,), padding=[(p, p)],
            rhs_dilation=(d,), dimension_numbers=('NCH', 'OIH', 'NCH'))
        y = y[:, :, :y.shape[2] - p]             # Chomp1d
        return y + b[None, :, :]

    h = jnp.maximum(conv(x, w1, b1), 0.0)
    out = jnp.maximum(conv(h, w2, b2), 0.0)
    if wd is not None:
        res = jnp.einsum('oc,ncl->nol', wd, x) + bd[None, :, :]
    else:
        res = x
    return jnp.maximum(out + res, 0.0)


def ref_tcn(x, params, kernel_size):
    for i, blk in enumerate(params):
        x = _ref_block(x, blk, kernel_size, 2 ** i)
    return x


# ----------------------------------- main -----------------------------------

if __name__ == "__main__":
    key = jax.random.PRNGKey(0)
    kx, kp = jax.random.split(key)

    N, num_inputs, L = 2, 4, 16
    num_channels = [8, 8]
    kernel_size = 3
    # dropout = 0.2  (identity at inference)

    x = jax.random.normal(kx, (N, num_inputs, L), jnp.float32)
    params = init_tcn_params(kp, num_inputs, num_channels, kernel_size)

    fwd = jax.jit(functools.partial(temporal_conv_net, kernel_size=kernel_size))
    out = jax.block_until_ready(fwd(x, params))

    ref = jax.block_until_ready(ref_tcn(x, params, kernel_size))
    assert out.shape == (N, num_channels[-1], L)
    # bf16 MXU operands with f32 accumulation vs an f32 reference -> bf16-level tol.
    assert jnp.allclose(out, ref, atol=3e-2, rtol=3e-2), \
        f"max abs err {jnp.max(jnp.abs(out - ref))}"

    print("KERNEL_OK")
</pallas_src>

<mosaic_0001>
module attributes {stable_mosaic.version = 11 : i64} {
  func.func @_tcn_kernel(%arg0: i32, %arg1: memref<4x128xf32, #tpu.memory_space<vmem>>, %arg2: memref<3x8x4xbf16, #tpu.memory_space<vmem>>, %arg3: memref<8x1xf32, #tpu.memory_space<vmem>>, %arg4: memref<3x8x8xbf16, #tpu.memory_space<vmem>>, %arg5: memref<8x1xf32, #tpu.memory_space<vmem>>, %arg6: memref<8x4xbf16, #tpu.memory_space<vmem>>, %arg7: memref<8x1xf32, #tpu.memory_space<vmem>>, %arg8: memref<3x8x8xbf16, #tpu.memory_space<vmem>>, %arg9: memref<8x1xf32, #tpu.memory_space<vmem>>, %arg10: memref<3x8x8xbf16, #tpu.memory_space<vmem>>, %arg11: memref<8x1xf32, #tpu.memory_space<vmem>>, %arg12: memref<8x128xf32, #tpu.memory_space<vmem>>) attributes {dimension_semantics = [#tpu.dimension_semantics<parallel>], iteration_bounds = array<i64: 2>, scalar_prefetch = 0 : i64, scratch_operands = 0 : i64, tpu.core_type = #tpu.core_type<tc>, window_params = [{transform_indices = @transform_0, window_bounds = array<i64: 4, 128>}, {pipeline_mode = #tpu.pipeline_mode<synchronous>, transform_indices = @transform_1, window_bounds = array<i64: 3, 8, 4>}, {pipeline_mode = #tpu.pipeline_mode<synchronous>, transform_indices = @transform_2, window_bounds = array<i64: 8, 1>}, {pipeline_mode = #tpu.pipeline_mode<synchronous>, transform_indices = @transform_3, window_bounds = array<i64: 3, 8, 8>}, {pipeline_mode = #tpu.pipeline_mode<synchronous>, transform_indices = @transform_4, window_bounds = array<i64: 8, 1>}, {pipeline_mode = #tpu.pipeline_mode<synchronous>, transform_indices = @transform_5, window_bounds = array<i64: 8, 4>}, {pipeline_mode = #tpu.pipeline_mode<synchronous>, transform_indices = @transform_6, window_bounds = array<i64: 8, 1>}, {pipeline_mode = #tpu.pipeline_mode<synchronous>, transform_indices = @transform_7, window_bounds = array<i64: 3, 8, 8>}, {pipeline_mode = #tpu.pipeline_mode<synchronous>, transform_indices = @transform_8, window_bounds = array<i64: 8, 1>}, {pipeline_mode = #tpu.pipeline_mode<synchronous>, transform_indices = @transform_9, window_bounds = array<i64: 3, 8, 8>}, {pipeline_mode = #tpu.pipeline_mode<synchronous>, transform_indices = @transform_10, window_bounds = array<i64: 8, 1>}, {transform_indices = @transform_11, window_bounds = array<i64: 8, 128>}]} {
    %0 = tpu.iota {dimensions = array<i32: 1>} : vector<1x128xi32>
    %c128_i32 = arith.constant 128 : i32
    %c0_i32 = arith.constant 0 : i32
    %1 = arith.cmpi eq, %c128_i32, %c0_i32 : i32
    %c1_i32 = arith.constant 1 : i32
    %2 = arith.select %1, %c1_i32, %c128_i32 : i32
    %3 = vector.broadcast %2 : i32 to vector<1x128xi32>
    %4 = arith.remsi %0, %3 : vector<1x128xi32>
    %c0_i32_0 = arith.constant 0 : i32
    %5 = vector.broadcast %c0_i32_0 : i32 to vector<1x128xi32>
    %6 = arith.cmpi ne, %4, %5 : vector<1x128xi32>
    %c0_i32_1 = arith.constant 0 : i32
    %7 = vector.broadcast %c0_i32_1 : i32 to vector<1x128xi32>
    %8 = arith.cmpi slt, %4, %7 : vector<1x128xi32>
    %c0_i32_2 = arith.constant 0 : i32
    %9 = arith.cmpi slt, %2, %c0_i32_2 : i32
    %10 = vector.broadcast %9 : i1 to vector<1x128xi1>
    %11 = vector.broadcast %10 : vector<1x128xi1> to vector<1x128xi1>
    %12 = arith.xori %8, %11 : vector<1x128xi1>
    %13 = arith.andi %12, %6 : vector<1x128xi1>
    %14 = vector.broadcast %2 : i32 to vector<1x128xi32>
    %15 = arith.addi %4, %14 : vector<1x128xi32>
    %16 = arith.select %13, %15, %4 : vector<1x128xi1>, vector<1x128xi32>
    %c4_i32 = arith.constant 4 : i32
    %17 = vector.broadcast %c4_i32 : i32 to vector<1x128xi32>
    %18 = arith.cmpi sge, %16, %17 : vector<1x128xi32>
    %c20_i32 = arith.constant 20 : i32
    %19 = vector.broadcast %c20_i32 : i32 to vector<1x128xi32>
    %20 = arith.cmpi slt, %16, %19 : vector<1x128xi32>
    %21 = arith.andi %18, %20 : vector<1x128xi1>
    %c0 = arith.constant 0 : index
    %c0_3 = arith.constant 0 : index
    %22 = vector.load %arg1[%c0, %c0_3] : memref<4x128xf32, #tpu.memory_space<vmem>>, vector<4x128xf32>
    %23 = arith.truncf %22 : vector<4x128xf32> to vector<4x128xbf16>
    %c2 = arith.constant 2 : index
    %c0_4 = arith.constant 0 : index
    %c0_5 = arith.constant 0 : index
    %24 = vector.load %arg2[%c2, %c0_4, %c0_5] : memref<3x8x4xbf16, #tpu.memory_space<vmem>>, vector<1x8x4xbf16>
    %25 = vector.shape_cast %24 : vector<1x8x4xbf16> to vector<8x4xbf16>
    %cst = arith.constant dense<0.000000e+00> : vector<8x128xf32>
    %26 = tpu.matmul %25, %23, %cst {dimension_numbers = #tpu.dot_dimension_numbers<[1], [0], [0], [1], [0, 0, 1, 1], [], []>} : vector<8x4xbf16>, vector<4x128xbf16>, vector<8x128xf32> -> vector<8x128xf32>
    %c2_i32 = arith.constant 2 : i32
    %27 = tpu.dynamic_rotate %22 by %c2_i32 dim 1 : vector<4x128xf32>, i32 -> vector<4x128xf32>
    %28 = arith.truncf %27 : vector<4x128xf32> to vector<4x128xbf16>
    %c0_6 = arith.constant 0 : index
    %c0_7 = arith.constant 0 : index
    %c0_8 = arith.constant 0 : index
    %29 = vector.load %arg2[%c0_6, %c0_7, %c0_8] : memref<3x8x4xbf16, #tpu.memory_space<vmem>>, vector<1x8x4xbf16>
    %30 = vector.shape_cast %29 : vector<1x8x4xbf16> to vector<8x4xbf16>
    %cst_9 = arith.constant dense<0.000000e+00> : vector<8x128xf32>
    %31 = tpu.matmul %30, %28, %cst_9 {dimension_numbers = #tpu.dot_dimension_numbers<[1], [0], [0], [1], [0, 0, 1, 1], [], []>} : vector<8x4xbf16>, vector<4x128xbf16>, vector<8x128xf32> -> vector<8x128xf32>
    %32 = arith.addf %26, %31 : vector<8x128xf32>
    %c1_i32_10 = arith.constant 1 : i32
    %33 = tpu.dynamic_rotate %22 by %c1_i32_10 dim 1 : vector<4x128xf32>, i32 -> vector<4x128xf32>
    %34 = arith.truncf %33 : vector<4x128xf32> to vector<4x128xbf16>
    %c1 = arith.constant 1 : index
    %c0_11 = arith.constant 0 : index
    %c0_12 = arith.constant 0 : index
    %35 = vector.load %arg2[%c1, %c0_11, %c0_12] : memref<3x8x4xbf16, #tpu.memory_space<vmem>>, vector<1x8x4xbf16>
    %36 = vector.shape_cast %35 : vector<1x8x4xbf16> to vector<8x4xbf16>
    %cst_13 = arith.constant dense<0.000000e+00> : vector<8x128xf32>
    %37 = tpu.matmul %36, %34, %cst_13 {dimension_numbers = #tpu.dot_dimension_numbers<[1], [0], [0], [1], [0, 0, 1, 1], [], []>} : vector<8x4xbf16>, vector<4x128xbf16>, vector<8x128xf32> -> vector<8x128xf32>
    %38 = arith.addf %32, %37 : vector<8x128xf32>
    %c0_14 = arith.constant 0 : index
    %c0_15 = arith.constant 0 : index
    %39 = vector.load %arg3[%c0_14, %c0_15] : memref<8x1xf32, #tpu.memory_space<vmem>>, vector<8x1xf32>
    %40 = vector.broadcast %39 : vector<8x1xf32> to vector<8x128xf32>
    %41 = arith.addf %38, %40 : vector<8x128xf32>
    %cst_16 = arith.constant 0.000000e+00 : f32
    %42 = vector.broadcast %cst_16 : f32 to vector<8x128xf32>
    %43 = arith.maximumf %41, %42 : vector<8x128xf32>
    %cst_17 = arith.constant 0.000000e+00 : f32
    %44 = vector.shape_cast %21 : vector<1x128xi1> to vector<1x128xi1>
    %45 = vector.broadcast %44 : vector<1x128xi1> to vector<8x128xi1>
    %46 = vector.broadcast %cst_17 : f32 to vector<8x128xf32>
    %47 = arith.select %45, %43, %46 : vector<8x128xi1>, vector<8x128xf32>
    %48 = arith.truncf %47 : vector<8x128xf32> to vector<8x128xbf16>
    %c2_18 = arith.constant 2 : index
    %c0_19 = arith.constant 0 : index
    %c0_20 = arith.constant 0 : index
    %49 = vector.load %arg4[%c2_18, %c0_19, %c0_20] : memref<3x8x8xbf16, #tpu.memory_space<vmem>>, vector<1x8x8xbf16>
    %50 = vector.shape_cast %49 : vector<1x8x8xbf16> to vector<8x8xbf16>
    %cst_21 = arith.constant dense<0.000000e+00> : vector<8x128xf32>
    %51 = tpu.matmul %50, %48, %cst_21 {dimension_numbers = #tpu.dot_dimension_numbers<[1], [0], [0], [1], [0, 0, 1, 1], [], []>} : vector<8x8xbf16>, vector<8x128xbf16>, vector<8x128xf32> -> vector<8x128xf32>
    %c2_i32_22 = arith.constant 2 : i32
    %52 = tpu.dynamic_rotate %47 by %c2_i32_22 dim 1 : vector<8x128xf32>, i32 -> vector<8x128xf32>
    %53 = arith.truncf %52 : vector<8x128xf32> to vector<8x128xbf16>
    %c0_23 = arith.constant 0 : index
    %c0_24 = arith.constant 0 : index
    %c0_25 = arith.constant 0 : index
    %54 = vector.load %arg4[%c0_23, %c0_24, %c0_25] : memref<3x8x8xbf16, #tpu.memory_space<vmem>>, vector<1x8x8xbf16>
    %55 = vector.shape_cast %54 : vector<1x8x8xbf16> to vector<8x8xbf16>
    %cst_26 = arith.constant dense<0.000000e+00> : vector<8x128xf32>
    %56 = tpu.matmul %55, %53, %cst_26 {dimension_numbers = #tpu.dot_dimension_numbers<[1], [0], [0], [1], [0, 0, 1, 1], [], []>} : vector<8x8xbf16>, vector<8x128xbf16>, vector<8x128xf32> -> vector<8x128xf32>
    %57 = arith.addf %51, %56 : vector<8x128xf32>
    %c1_i32_27 = arith.constant 1 : i32
    %58 = tpu.dynamic_rotate %47 by %c1_i32_27 dim 1 : vector<8x128xf32>, i32 -> vector<8x128xf32>
    %59 = arith.truncf %58 : vector<8x128xf32> to vector<8x128xbf16>
    %c1_28 = arith.constant 1 : index
    %c0_29 = arith.constant 0 : index
    %c0_30 = arith.constant 0 : index
    %60 = vector.load %arg4[%c1_28, %c0_29, %c0_30] : memref<3x8x8xbf16, #tpu.memory_space<vmem>>, vector<1x8x8xbf16>
    %61 = vector.shape_cast %60 : vector<1x8x8xbf16> to vector<8x8xbf16>
    %cst_31 = arith.constant dense<0.000000e+00> : vector<8x128xf32>
    %62 = tpu.matmul %61, %59, %cst_31 {dimension_numbers = #tpu.dot_dimension_numbers<[1], [0], [0], [1], [0, 0, 1, 1], [], []>} : vector<8x8xbf16>, vector<8x128xbf16>, vector<8x128xf32> -> vector<8x128xf32>
    %63 = arith.addf %57, %62 : vector<8x128xf32>
    %c0_32 = arith.constant 0 : index
    %c0_33 = arith.constant 0 : index
    %64 = vector.load %arg5[%c0_32, %c0_33] : memref<8x1xf32, #tpu.memory_space<vmem>>, vector<8x1xf32>
    %65 = vector.broadcast %64 : vector<8x1xf32> to vector<8x128xf32>
    %66 = arith.addf %63, %65 : vector<8x128xf32>
    %cst_34 = arith.constant 0.000000e+00 : f32
    %67 = vector.broadcast %cst_34 : f32 to vector<8x128xf32>
    %68 = arith.maximumf %66, %67 : vector<8x128xf32>
    %c0_35 = arith.constant 0 : index
    %c0_36 = arith.constant 0 : index
    %69 = vector.load %arg6[%c0_35, %c0_36] : memref<8x4xbf16, #tpu.memory_space<vmem>>, vector<8x4xbf16>
    %cst_37 = arith.constant dense<0.000000e+00> : vector<8x128xf32>
    %70 = tpu.matmul %69, %23, %cst_37 {dimension_numbers = #tpu.dot_dimension_numbers<[1], [0], [0], [1], [0, 0, 1, 1], [], []>} : vector<8x4xbf16>, vector<4x128xbf16>, vector<8x128xf32> -> vector<8x128xf32>
    %c0_38 = arith.constant 0 : index
    %c0_39 = arith.constant 0 : index
    %71 = vector.load %arg7[%c0_38, %c0_39] : memref<8x1xf32, #tpu.memory_space<vmem>>, vector<8x1xf32>
    %72 = vector.broadcast %71 : vector<8x1xf32> to vector<8x128xf32>
    %73 = arith.addf %70, %72 : vector<8x128xf32>
    %74 = arith.addf %68, %73 : vector<8x128xf32>
    %cst_40 = arith.constant 0.000000e+00 : f32
    %75 = vector.broadcast %cst_40 : f32 to vector<8x128xf32>
    %76 = arith.maximumf %74, %75 : vector<8x128xf32>
    %cst_41 = arith.constant 0.000000e+00 : f32
    %77 = vector.shape_cast %21 : vector<1x128xi1> to vector<1x128xi1>
    %78 = vector.broadcast %77 : vector<1x128xi1> to vector<8x128xi1>
    %79 = vector.broadcast %cst_41 : f32 to vector<8x128xf32>
    %80 = arith.select %78, %76, %79 : vector<8x128xi1>, vector<8x128xf32>
    %81 = arith.truncf %80 : vector<8x128xf32> to vector<8x128xbf16>
    %c2_42 = arith.constant 2 : index
    %c0_43 = arith.constant 0 : index
    %c0_44 = arith.constant 0 : index
    %82 = vector.load %arg8[%c2_42, %c0_43, %c0_44] : memref<3x8x8xbf16, #tpu.memory_space<vmem>>, vector<1x8x8xbf16>
    %83 = vector.shape_cast %82 : vector<1x8x8xbf16> to vector<8x8xbf16>
    %cst_45 = arith.constant dense<0.000000e+00> : vector<8x128xf32>
    %84 = tpu.matmul %83, %81, %cst_45 {dimension_numbers = #tpu.dot_dimension_numbers<[1], [0], [0], [1], [0, 0, 1, 1], [], []>} : vector<8x8xbf16>, vector<8x128xbf16>, vector<8x128xf32> -> vector<8x128xf32>
    %c4_i32_46 = arith.constant 4 : i32
    %85 = tpu.dynamic_rotate %80 by %c4_i32_46 dim 1 : vector<8x128xf32>, i32 -> vector<8x128xf32>
    %86 = arith.truncf %85 : vector<8x128xf32> to vector<8x128xbf16>
    %c0_47 = arith.constant 0 : index
    %c0_48 = arith.constant 0 : index
    %c0_49 = arith.constant 0 : index
    %87 = vector.load %arg8[%c0_47, %c0_48, %c0_49] : memref<3x8x8xbf16, #tpu.memory_space<vmem>>, vector<1x8x8xbf16>
    %88 = vector.shape_cast %87 : vector<1x8x8xbf16> to vector<8x8xbf16>
    %cst_50 = arith.constant dense<0.000000e+00> : vector<8x128xf32>
    %89 = tpu.matmul %88, %86, %cst_50 {dimension_numbers = #tpu.dot_dimension_numbers<[1], [0], [0], [1], [0, 0, 1, 1], [], []>} : vector<8x8xbf16>, vector<8x128xbf16>, vector<8x128xf32> -> vector<8x128xf32>
    %90 = arith.addf %84, %89 : vector<8x128xf32>
    %c2_i32_51 = arith.constant 2 : i32
    %91 = tpu.dynamic_rotate %80 by %c2_i32_51 dim 1 : vector<8x128xf32>, i32 -> vector<8x128xf32>
    %92 = arith.truncf %91 : vector<8x128xf32> to vector<8x128xbf16>
    %c1_52 = arith.constant 1 : index
    %c0_53 = arith.constant 0 : index
    %c0_54 = arith.constant 0 : index
    %93 = vector.load %arg8[%c1_52, %c0_53, %c0_54] : memref<3x8x8xbf16, #tpu.memory_space<vmem>>, vector<1x8x8xbf16>
    %94 = vector.shape_cast %93 : vector<1x8x8xbf16> to vector<8x8xbf16>
    %cst_55 = arith.constant dense<0.000000e+00> : vector<8x128xf32>
    %95 = tpu.matmul %94, %92, %cst_55 {dimension_numbers = #tpu.dot_dimension_numbers<[1], [0], [0], [1], [0, 0, 1, 1], [], []>} : vector<8x8xbf16>, vector<8x128xbf16>, vector<8x128xf32> -> vector<8x128xf32>
    %96 = arith.addf %90, %95 : vector<8x128xf32>
    %c0_56 = arith.constant 0 : index
    %c0_57 = arith.constant 0 : index
    %97 = vector.load %arg9[%c0_56, %c0_57] : memref<8x1xf32, #tpu.memory_space<vmem>>, vector<8x1xf32>
    %98 = vector.broadcast %97 : vector<8x1xf32> to vector<8x128xf32>
    %99 = arith.addf %96, %98 : vector<8x128xf32>
    %cst_58 = arith.constant 0.000000e+00 : f32
    %100 = vector.broadcast %cst_58 : f32 to vector<8x128xf32>
    %101 = arith.maximumf %99, %100 : vector<8x128xf32>
    %cst_59 = arith.constant 0.000000e+00 : f32
    %102 = vector.shape_cast %21 : vector<1x128xi1> to vector<1x128xi1>
    %103 = vector.broadcast %102 : vector<1x128xi1> to vector<8x128xi1>
    %104 = vector.broadcast %cst_59 : f32 to vector<8x128xf32>
    %105 = arith.select %103, %101, %104 : vector<8x128xi1>, vector<8x128xf32>
    %106 = arith.truncf %105 : vector<8x128xf32> to vector<8x128xbf16>
    %c2_60 = arith.constant 2 : index
    %c0_61 = arith.constant 0 : index
    %c0_62 = arith.constant 0 : index
    %107 = vector.load %arg10[%c2_60, %c0_61, %c0_62] : memref<3x8x8xbf16, #tpu.memory_space<vmem>>, vector<1x8x8xbf16>
    %108 = vector.shape_cast %107 : vector<1x8x8xbf16> to vector<8x8xbf16>
    %cst_63 = arith.constant dense<0.000000e+00> : vector<8x128xf32>
    %109 = tpu.matmul %108, %106, %cst_63 {dimension_numbers = #tpu.dot_dimension_numbers<[1], [0], [0], [1], [0, 0, 1, 1], [], []>} : vector<8x8xbf16>, vector<8x128xbf16>, vector<8x128xf32> -> vector<8x128xf32>
    %c4_i32_64 = arith.constant 4 : i32
    %110 = tpu.dynamic_rotate %105 by %c4_i32_64 dim 1 : vector<8x128xf32>, i32 -> vector<8x128xf32>
    %111 = arith.truncf %110 : vector<8x128xf32> to vector<8x128xbf16>
    %c0_65 = arith.constant 0 : index
    %c0_66 = arith.constant 0 : index
    %c0_67 = arith.constant 0 : index
    %112 = vector.load %arg10[%c0_65, %c0_66, %c0_67] : memref<3x8x8xbf16, #tpu.memory_space<vmem>>, vector<1x8x8xbf16>
    %113 = vector.shape_cast %112 : vector<1x8x8xbf16> to vector<8x8xbf16>
    %cst_68 = arith.constant dense<0.000000e+00> : vector<8x128xf32>
    %114 = tpu.matmul %113, %111, %cst_68 {dimension_numbers = #tpu.dot_dimension_numbers<[1], [0], [0], [1], [0, 0, 1, 1], [], []>} : vector<8x8xbf16>, vector<8x128xbf16>, vector<8x128xf32> -> vector<8x128xf32>
    %115 = arith.addf %109, %114 : vector<8x128xf32>
    %c2_i32_69 = arith.constant 2 : i32
    %116 = tpu.dynamic_rotate %105 by %c2_i32_69 dim 1 : vector<8x128xf32>, i32 -> vector<8x128xf32>
    %117 = arith.truncf %116 : vector<8x128xf32> to vector<8x128xbf16>
    %c1_70 = arith.constant 1 : index
    %c0_71 = arith.constant 0 : index
    %c0_72 = arith.constant 0 : index
    %118 = vector.load %arg10[%c1_70, %c0_71, %c0_72] : memref<3x8x8xbf16, #tpu.memory_space<vmem>>, vector<1x8x8xbf16>
    %119 = vector.shape_cast %118 : vector<1x8x8xbf16> to vector<8x8xbf16>
    %cst_73 = arith.constant dense<0.000000e+00> : vector<8x128xf32>
    %120 = tpu.matmul %119, %117, %cst_73 {dimension_numbers = #tpu.dot_dimension_numbers<[1], [0], [0], [1], [0, 0, 1, 1], [], []>} : vector<8x8xbf16>, vector<8x128xbf16>, vector<8x128xf32> -> vector<8x128xf32>
    %121 = arith.addf %115, %120 : vector<8x128xf32>
    %c0_74 = arith.constant 0 : index
    %c0_75 = arith.constant 0 : index
    %122 = vector.load %arg11[%c0_74, %c0_75] : memref<8x1xf32, #tpu.memory_space<vmem>>, vector<8x1xf32>
    %123 = vector.broadcast %122 : vector<8x1xf32> to vector<8x128xf32>
    %124 = arith.addf %121, %123 : vector<8x128xf32>
    %cst_76 = arith.constant 0.000000e+00 : f32
    %125 = vector.broadcast %cst_76 : f32 to vector<8x128xf32>
    %126 = arith.maximumf %124, %125 : vector<8x128xf32>
    %127 = arith.addf %126, %80 : vector<8x128xf32>
    %cst_77 = arith.constant 0.000000e+00 : f32
    %128 = vector.broadcast %cst_77 : f32 to vector<8x128xf32>
    %129 = arith.maximumf %127, %128 : vector<8x128xf32>
    %cst_78 = arith.constant 0.000000e+00 : f32
    %130 = vector.shape_cast %21 : vector<1x128xi1> to vector<1x128xi1>
    %131 = vector.broadcast %130 : vector<1x128xi1> to vector<8x128xi1>
    %132 = vector.broadcast %cst_78 : f32 to vector<8x128xf32>
    %133 = arith.select %131, %129, %132 : vector<8x128xi1>, vector<8x128xf32>
    %c0_79 = arith.constant 0 : index
    %c0_80 = arith.constant 0 : index
    %134 = vector.load %arg12[%c0_79, %c0_80] : memref<8x128xf32, #tpu.memory_space<vmem>>, vector<8x128xf32>
    tpu.vector_store %arg12[%c0_79, %c0_80], %133 {strides = array<i32>} : memref<8x128xf32, #tpu.memory_space<vmem>>, vector<8x128xf32>,
    return
  }
  func.func @transform_0(%arg0: i32) -> (i32, i32) {
    %c0_i32 = arith.constant 0 : i32
    %c0_i32_0 = arith.constant 0 : i32
    return %c0_i32, %arg0 : i32, i32
  }
  func.func @transform_1(%arg0: i32) -> (i32, i32, i32) {
    %c0_i32 = arith.constant 0 : i32
    %c0_i32_0 = arith.constant 0 : i32
    %c0_i32_1 = arith.constant 0 : i32
    %c0_i32_2 = arith.constant 0 : i32
    return %c0_i32, %c0_i32_0, %c0_i32_1 : i32, i32, i32
  }
  func.func @transform_2(%arg0: i32) -> (i32, i32) {
    %c0_i32 = arith.constant 0 : i32
    %c0_i32_0 = arith.constant 0 : i32
    %c0_i32_1 = arith.constant 0 : i32
    return %c0_i32, %c0_i32_0 : i32, i32
  }
  func.func @transform_3(%arg0: i32) -> (i32, i32, i32) {
    %c0_i32 = arith.constant 0 : i32
    %c0_i32_0 = arith.constant 0 : i32
    %c0_i32_1 = arith.constant 0 : i32
    %c0_i32_2 = arith.constant 0 : i32
    return %c0_i32, %c0_i32_0, %c0_i32_1 : i32, i32, i32
  }
  func.func @transform_4(%arg0: i32) -> (i32, i32) {
    %c0_i32 = arith.constant 0 : i32
    %c0_i32_0 = arith.constant 0 : i32
    %c0_i32_1 = arith.constant 0 : i32
    return %c0_i32, %c0_i32_0 : i32, i32
  }
  func.func @transform_5(%arg0: i32) -> (i32, i32) {
    %c0_i32 = arith.constant 0 : i32
    %c0_i32_0 = arith.constant 0 : i32
    %c0_i32_1 = arith.constant 0 : i32
    return %c0_i32, %c0_i32_0 : i32, i32
  }
  func.func @transform_6(%arg0: i32) -> (i32, i32) {
    %c0_i32 = arith.constant 0 : i32
    %c0_i32_0 = arith.constant 0 : i32
    %c0_i32_1 = arith.constant 0 : i32
    return %c0_i32, %c0_i32_0 : i32, i32
  }
  func.func @transform_7(%arg0: i32) -> (i32, i32, i32) {
    %c0_i32 = arith.constant 0 : i32
    %c0_i32_0 = arith.constant 0 : i32
    %c0_i32_1 = arith.constant 0 : i32
    %c0_i32_2 = arith.constant 0 : i32
    return %c0_i32, %c0_i32_0, %c0_i32_1 : i32, i32, i32
  }
  func.func @transform_8(%arg0: i32) -> (i32, i32) {
    %c0_i32 = arith.constant 0 : i32
    %c0_i32_0 = arith.constant 0 : i32
    %c0_i32_1 = arith.constant 0 : i32
    return %c0_i32, %c0_i32_0 : i32, i32
  }
  func.func @transform_9(%arg0: i32) -> (i32, i32, i32) {
    %c0_i32 = arith.constant 0 : i32
    %c0_i32_0 = arith.constant 0 : i32
    %c0_i32_1 = arith.constant 0 : i32
    %c0_i32_2 = arith.constant 0 : i32
    return %c0_i32, %c0_i32_0, %c0_i32_1 : i32, i32, i32
  }
  func.func @transform_10(%arg0: i32) -> (i32, i32) {
    %c0_i32 = arith.constant 0 : i32
    %c0_i32_0 = arith.constant 0 : i32
    %c0_i32_1 = arith.constant 0 : i32
    return %c0_i32, %c0_i32_0 : i32, i32
  }
  func.func @transform_11(%arg0: i32) -> (i32, i32) {
    %c0_i32 = arith.constant 0 : i32
    %c0_i32_0 = arith.constant 0 : i32
    return %c0_i32, %arg0 : i32, i32
  }
}

</mosaic_0001>

<bundles_post_ra>
// kernel: temporal_conv_net.1
= control target key start
LH: loop header
LB: loop body
LE: loop exit
PB: predicated region body
PF: predicated region fallthrough
CT: control target
= control target key end

     0   :  { %s1379_s17 = smov 0   ;;  %s1549_s0 = inlined_call_operand.vmem [shape: f32[4,256], index: 0, kind: input, shape index: {}]   ;;  %s1550_s1 = inlined_call_operand.vmem [shape: bf16[3,8,4], index: 1, kind: input, shape index: {}]   ;;  %s1551_s2 = inlined_call_operand.vmem [shape: f32[8,1], index: 2, kind: input, shape index: {}]   ;;  %s1552_s3 = inlined_call_operand.vmem [shape: bf16[3,8,8], index: 3, kind: input, shape index: {}]   ;;  %s1553_s4 = inlined_call_operand.vmem [shape: f32[8,1], index: 4, kind: input, shape index: {}]   ;;  %s1554_s5 = inlined_call_operand.vmem [shape: bf16[8,4], index: 5, kind: input, shape index: {}]   ;;  %s1555_s6 = inlined_call_operand.vmem [shape: f32[8,1], index: 6, kind: input, shape index: {}]   ;;  %s1556_s7 = inlined_call_operand.vmem [shape: bf16[3,8,8], index: 7, kind: input, shape index: {}]   ;;  %s1557_s8 = inlined_call_operand.vmem [shape: f32[8,1], index: 8, kind: input, shape index: {}]   ;;  %s1558_s9 = inlined_call_operand.vmem [shape: bf16[3,8,8], index: 9, kind: input, shape index: {}]   ;;  %s1559_s10 = inlined_call_operand.vmem [shape: f32[8,1], index: 10, kind: input, shape index: {}]   ;;  %s1560_s11 = inlined_call_operand.vmem [shape: f32[8,256], index: 11, kind: output, shape index: {}]  }
   0x1 LB: > { %s1155_s18 = sadd.s32 4294967295, %s1311_s17   ;;  %p1159_p0 = scmp.ge.s32.totalorder %s1311_s17, 1  ;;  %s1311_s17 = sphi %s1379_s17, %s21_s17  }
   0x2   : > { %p336_p1 = scmp.lt.s32.totalorder %s1311_s17, 3 }
   0x4   : > { %p337_p2 = pnand %p1159_p0, %p336_p1 }
   0x5   : > { %p374_p3 = scmp.lt.s32.totalorder (!%p337_p2), %s1155_s18, 1  ;;  %s1315_s23 = smov (!%p337_p2), 2  }
   0x6   : > { %340 = sbr.rel (%p337_p2) target bundleno = 1340 (0x53c), region = 64  ;;  %s1317_s28 = smov (!%p337_p2), 1  }
   0x7   : > { %s1318_s12 = smov (!%p337_p2), 4  }
   0xb   : > { %v1313_v0 = vmov 0.0   ;;  %s1564_s18 = smov (!%p374_p3, %s1155_s18), 1  ;;  %vm1314_vm0 = vmmov 0   ;;  %vm412_vm1 = vcmask 1041408   ;;  %v554_v3 = vld [vmem:[%s1551_s2] sm:$0xff]  ;;  %v1316_v5 = vmov 0  }
   0xc   : > { %1211 = vmatprep.subr.bf16.mxu0 %v1313_v0  ;;  %1217 = vmatprep.subr.bf16.mxu1 %v1313_v0  ;;  %s1160_s19 = sshll.u32 %s1564_s18, 2  ;;  %vm408_vm2 = vcmask 31744   ;;  %v1162_v6 = vld [vmem:[%s1550_s1 + $0x8] sm:$0xf]  ;;  %v407_v10 = vld [vmem:[%s1550_s1] sm:$0xf]  ;;  %v383_v20 = vlaneseq }
   0xd   : > { %1213 = vmatprep.mubr.msk.bf16.mxu0 %vm1314_vm0, %v1313_v0  ;;  %1219 = vmatprep.mubr.msk.bf16.mxu1 %vm1314_vm0, %v1313_v0  ;;  %s377_s22 = scalar_lea.vmem %s1549_s0, %s1160_s19  ;;  %v1165_v14 = vld [vmem:[%s1550_s1 + $0x4] sm:$0xf]  ;;  %vm576_vm6 = vcmask 1043456   ;;  %v1167_v40 = vld [vmem:[%s1552_s3 + $0x8] sm:$0xf]  ;;  %vm572_vm7 = vcmask 64512  }
   0xe   : > { %v400_v1 = vld [vmem:[%s377_s22] sm:$0xf]  ;;  %1303 = vset.pattern.permute.xlu1 %v1316_v5  ;;  %1304 = vset.pattern.permute.xlu0 %v1316_v5  ;;  %v384_v23 = vand.u32 127, %v383_v20  ;;  %v1170_v50 = vld [vmem:[%s1552_s3 + $0x4] sm:$0xf]  ;;  %s1161_s29 = sshll.u32 %s1564_s18, 3 }
   0xf   : > { %404 = vrot.lane.b32.xlu0 %v400_v1, %s1315_s23  ;;  %v401_v2 = vpack.c.bf16 %v400_v1, %v400_v1  ;;  %557 = vperm.xlu1 %1303, %v554_v3   ;;  %v718_v37 = vld [vmem:[%s1553_s4] sm:$0xff]  ;;  %s381_s13 = scalar_lea.vmem %s1560_s11, %s1161_s29 }
  0x10   : > { %vm397_vm3 = vcmp.ge.s32.totalorder %v384_v23, 4  ;;  %vm398_vm4 = vcmp.lt.s32.totalorder %v384_v23, 20  ;;  %v727_v39 = vld [vmem:[%s1555_s6] sm:$0xff] }
  0x11   : > { %v1404_v4 = vsel %vm412_vm1, %v401_v2, 0  ;;  %vm1431_vm5 = vmand %vm397_vm3, %vm398_vm4  ;;  %v930_v41 = vld [vmem:[%s1557_s8] sm:$0xff] }
  0x12   : > { %1218 = vmatpush3.bf16.msra.mxu1 %v1404_v4  ;;  %v726_v42 = vld [vmem:[%s1554_s5] sm:$0xf] }
  0x13   : > { %502 = vrot.lane.b32.xlu0 %v400_v1, %s1317_s28  ;;  %1229 = vmatprep.subr.bf16.mxu1 %v1313_v0  ;;  %v571_v48 = vld [vmem:[%s1552_s3] sm:$0xf] }
  0x15   : > { %1220 = vmatmul.mubr.msk.bf16.vlgmr.msra.gmra.mxu1 %vm408_vm2, %v1162_v6 }
  0x16   : > { %1231 = vmatprep.mubr.msk.bf16.mxu1 %vm1314_vm0, %v1313_v0 }
  0x81   : > { %v405_v7 = vpop.permute.xlu0 %404 }
  0x82   : > { %v406_v8 = vpack.c.bf16 %v405_v7, %v405_v7 }
  0x84   : > { %v414_v9 = vsel %vm412_vm1, %v406_v8, 0 }
  0x85   : > { %1212 = vmatpush3.bf16.msra.mxu0 %v414_v9  ;;  %v503_v11 = vpop.permute.xlu0 %502 }
  0x86   : > { %v504_v12 = vpack.c.bf16 %v503_v11, %v503_v11  ;;  %1223 = vmatprep.subr.bf16.mxu0 %v1313_v0 }
  0x88   : > { %1214 = vmatmul.mubr.msk.bf16.vlgmr.msra.gmra.mxu0 %vm408_vm2, %v407_v10  ;;  %v511_v13 = vsel %vm412_vm1, %v504_v12, 0 }
  0x89   : > { %1224 = vmatpush3.bf16.msra.mxu0 %v511_v13  ;;  %1225 = vmatprep.mubr.msk.bf16.mxu0 %vm1314_vm0, %v1313_v0 }
  0x8a   : > { %1235 = vmatprep.subr.bf16.mxu0 %v1313_v0  ;;  %v558_v27 = vpop.permute.xlu1 %557 }
  0x90   : > { %1226 = vmatmul.mubr.msk.bf16.vlgmr.msra.gmra.mxu0 %vm408_vm2, %v1165_v14 }
  0x91   : > { %1237 = vmatprep.mubr.msk.bf16.mxu0 %vm1314_vm0, %v1313_v0 }
  0xd5   : > { %v496_v15 = vpop.f32.mrf.mxu1 }
  0xd7   : > { %v1221_v16 = vpop.f32.mrf.mxu1 }
  0xd8   : > { %v1173_v16 = vld [vmem:[%s1556_s7 + $0x8] sm:$0xf] }
  0xd9   : > { %v499_v17 = vpop.f32.mrf.mxu1 }
  0xdb   : > { %v1222_v18 = vpop.f32.mrf.mxu1 }
 0x148   : > { %v450_v19 = vpop.f32.mrf.mxu0 }
 0x149   : > { %v497_v25 = vadd.f32 %v496_v15, %v450_v19 }
 0x14a   : > { %v1215_v21 = vpop.f32.mrf.mxu0 }
 0x14b   : > { %v785_v21 = vld [vmem:[%s1556_s7] sm:$0xf] }
 0x14c   : > { %v453_v22 = vpop.f32.mrf.mxu0 }
 0x14e   : > { %v1216_v24 = vpop.f32.mrf.mxu0 }
 0x14f   : > { %v1176_v24 = vld [vmem:[%s1556_s7 + $0x4] sm:$0xf] }
 0x150   : > { %v547_v26 = vpop.f32.mrf.mxu0 }
 0x151   : > { %v553_v28 = vadd.f32 %v547_v26, %v497_v25 }
 0x152   : > { %v1227_v29 = vpop.f32.mrf.mxu0 }
 0x153   : > { %v560_v30 = vadd.f32 %v558_v27, %v553_v28 }
 0x154   : > { %v550_v31 = vpop.f32.mrf.mxu0 }
 0x155   : > { %v561_v33 = vmax.f32 %v560_v30, 0.0 }
 0x156   : > { %v1228_v34 = vpop.f32.mrf.mxu0 }
 0x157   : > { %v564_v35 = vsel %vm1431_vm5, %v561_v33, 0.0 }
 0x158   : > { %666 = vrot.lane.b32.xlu0 %v564_v35, %s1317_s28  ;;  %v565_v36 = vpack.c.bf16 %v564_v35, %v564_v35  ;;  %568 = vrot.lane.b32.xlu1 %v564_v35, %s1315_s23 }
 0x15a   : > { %v624_v38 = vsel %vm576_vm6, %v565_v36, 0 }
 0x15b   : > { %1236 = vmatpush3.bf16.msra.mxu0 %v624_v38 }
 0x15c   : > { %721 = vperm.xlu1 %1303, %v718_v37   ;;  %1247 = vmatprep.subr.bf16.mxu0 %v1313_v0 }
 0x15d   : > { %730 = vperm.xlu0 %1304, %v727_v39  }
 0x15e   : > { %1238 = vmatmul.mubr.msk.bf16.vlgmr.msra.gmra.mxu0 %vm572_vm7, %v1167_v40 }
 0x15f   : > { %1248 = vmatpush3.bf16.msra.mxu0 %v1404_v4  ;;  %1249 = vmatprep.mubr.msk.bf16.mxu0 %vm1314_vm0, %v1313_v0 }
 0x160   : > { %1259 = vmatprep.subr.bf16.mxu0 %v1313_v0 }
 0x161   : > { %933 = vperm.xlu0 %1304, %v930_v41  }
 0x166   : > { %1250 = vmatmul.mubr.msk.bf16.vlgmr.msra.gmra.mxu0 %vm408_vm2, %v726_v42 }
 0x167   : > { %1261 = vmatprep.mubr.msk.bf16.mxu0 %vm1314_vm0, %v1313_v0 }
 0x1ca   : > { %v667_v43 = vpop.permute.xlu0 %666  ;;  %v569_v44 = vpop.permute.xlu1 %568 }
 0x1cb   : > { %v570_v45 = vpack.c.bf16 %v569_v44, %v569_v44  ;;  %v668_v46 = vpack.c.bf16 %v667_v43, %v667_v43 }
 0x1cd   : > { %v578_v47 = vsel %vm576_vm6, %v570_v45, 0  ;;  %v675_v49 = vsel %vm576_vm6, %v668_v46, 0  ;;  %v1090_v45 = vld [vmem:[%s1559_s10] sm:$0xff] }
 0x1ce   : > { %1230 = vmatpush3.bf16.msra.mxu1 %v578_v47  ;;  %v1178_v47 = vld [vmem:[%s1558_s9 + $0x8] sm:$0xf] }
 0x1cf   : > { %1241 = vmatprep.subr.bf16.mxu1 %v1313_v0 }
 0x1d1   : > { %1232 = vmatmul.mubr.msk.bf16.vlgmr.msra.gmra.mxu1 %vm572_vm7, %v571_v48 }
 0x1d2   : > { %1242 = vmatpush3.bf16.msra.mxu1 %v675_v49  ;;  %1243 = vmatprep.mubr.msk.bf16.mxu1 %vm1314_vm0, %v1313_v0 }
 0x1d3   : > { %1253 = vmatprep.subr.bf16.mxu1 %v1313_v0 }
 0x1d7   : > { %v722_v2 = vpop.permute.xlu1 %721 }
 0x1d8   : > { %v731_v4 = vpop.permute.xlu0 %730 }
 0x1d9   : > { %1244 = vmatmul.mubr.msk.bf16.vlgmr.msra.gmra.mxu1 %vm572_vm7, %v1170_v50 }
 0x1da   : > { %1255 = vmatprep.mubr.msk.bf16.mxu1 %vm1314_vm0, %v1313_v0 }
 0x1dc   : > { %v934_v37 = vpop.permute.xlu0 %933 }
 0x21e   : > { %v660_v51 = vpop.f32.mrf.mxu0 }
 0x220   : > { %v1239_v52 = vpop.f32.mrf.mxu0 }
 0x222   : > { %v663_v53 = vpop.f32.mrf.mxu0 }
 0x223   : > { %v945_v53 = vld [vmem:[%s1558_s9] sm:$0xf] }
 0x224   : > { %v1240_v54 = vpop.f32.mrf.mxu0 }
 0x226   : > { %v770_v55 = vpop.f32.mrf.mxu0 }
 0x227   : > { %v771_v6 = vadd.f32 %v770_v55, %v731_v4  ;;  %v1181_v55 = vld [vmem:[%s1558_s9 + $0x4] sm:$0xf] }
 0x228   : > { %v1251_v56 = vpop.f32.mrf.mxu0 }
 0x22a   : > { %v773_v57 = vpop.f32.mrf.mxu0 }
 0x22c   : > { %v1252_v58 = vpop.f32.mrf.mxu0 }
 0x291   : > { %v614_v59 = vpop.f32.mrf.mxu1 }
 0x292   : > { %v661_v63 = vadd.f32 %v660_v51, %v614_v59 }
 0x293   : > { %v1233_v60 = vpop.f32.mrf.mxu1 }
 0x295   : > { %v617_v61 = vpop.f32.mrf.mxu1 }
 0x297   : > { %v1234_v62 = vpop.f32.mrf.mxu1 }
 0x299   : > { %v711_v1 = vpop.f32.mrf.mxu1 }
 0x29a   : > { %v717_v3 = vadd.f32 %v711_v1, %v661_v63 }
 0x29b   : > { %v1245_v5 = vpop.f32.mrf.mxu1 }
 0x29c   : > { %v724_v7 = vadd.f32 %v722_v2, %v717_v3 }
 0x29d   : > { %v714_v8 = vpop.f32.mrf.mxu1 }
 0x29e   : > { %v725_v9 = vmax.f32 %v724_v7, 0.0 }
 0x29f   : > { %v1246_v10 = vpop.f32.mrf.mxu1 }
 0x2a0   : > { %v776_v11 = vadd.f32 %v771_v6, %v725_v9 }
 0x2a2   : > { %v777_v12 = vmax.f32 %v776_v11, 0.0 }
 0x2a4   : > { %v1482_v13 = vsel %vm1431_vm5, %v777_v12, 0.0 }
 0x2a5   : > { %782 = vrot.lane.b32.xlu1 %v1482_v13, %s1318_s12  ;;  %v779_v14 = vpack.c.bf16 %v1482_v13, %v1482_v13 }
 0x2a7   : > { %v836_v15 = vsel %vm576_vm6, %v779_v14, 0 }
 0x2a8   : > { %1260 = vmatpush3.bf16.msra.mxu0 %v836_v15 }
 0x2a9   : > { %878 = vrot.lane.b32.xlu1 %v1482_v13, %s1315_s23  ;;  %1271 = vmatprep.subr.bf16.mxu0 %v1313_v0 }
 0x2ab   : > { %1262 = vmatmul.mubr.msk.bf16.vlgmr.msra.gmra.mxu0 %vm572_vm7, %v1173_v16 }
 0x2ac   : > { %1273 = vmatprep.mubr.msk.bf16.mxu0 %vm1314_vm0, %v1313_v0 }
 0x317   : > { %v783_v17 = vpop.permute.xlu1 %782 }
 0x318   : > { %v784_v18 = vpack.c.bf16 %v783_v17, %v783_v17 }
 0x31a   : > { %v790_v19 = vsel %vm576_vm6, %v784_v18, 0 }
 0x31b   : > { %1254 = vmatpush3.bf16.msra.mxu1 %v790_v19  ;;  %v879_v20 = vpop.permute.xlu1 %878 }
 0x31c   : > { %v880_v22 = vpack.c.bf16 %v879_v20, %v879_v20  ;;  %1265 = vmatprep.subr.bf16.mxu1 %v1313_v0 }
 0x31e   : > { %v887_v23 = vsel %vm576_vm6, %v880_v22, 0  ;;  %1256 = vmatmul.mubr.msk.bf16.vlgmr.msra.gmra.mxu1 %vm572_vm7, %v785_v21 }
 0x31f   : > { %1266 = vmatpush3.bf16.msra.mxu1 %v887_v23  ;;  %1267 = vmatprep.mubr.msk.bf16.mxu1 %vm1314_vm0, %v1313_v0 }
 0x320   : > { %1277 = vmatprep.subr.bf16.mxu1 %v1313_v0 }
 0x326   : > { %1268 = vmatmul.mubr.msk.bf16.vlgmr.msra.gmra.mxu1 %vm572_vm7, %v1176_v24 }
 0x327   : > { %1279 = vmatprep.mubr.msk.bf16.mxu1 %vm1314_vm0, %v1313_v0 }
 0x36b   : > { %v872_v25 = vpop.f32.mrf.mxu0 }
 0x36d   : > { %v1263_v26 = vpop.f32.mrf.mxu0 }
 0x36f   : > { %v875_v27 = vpop.f32.mrf.mxu0 }
 0x371   : > { %v1264_v28 = vpop.f32.mrf.mxu0 }
 0x3de   : > { %v826_v29 = vpop.f32.mrf.mxu1 }
 0x3df   : > { %v873_v34 = vadd.f32 %v872_v25, %v826_v29 }
 0x3e0   : > { %v1257_v30 = vpop.f32.mrf.mxu1 }
 0x3e2   : > { %v829_v31 = vpop.f32.mrf.mxu1 }
 0x3e4   : > { %v1258_v33 = vpop.f32.mrf.mxu1 }
 0x3e6   : > { %v923_v35 = vpop.f32.mrf.mxu1 }
 0x3e7   : > { %v929_v36 = vadd.f32 %v923_v35, %v873_v34 }
 0x3e8   : > { %v1269_v38 = vpop.f32.mrf.mxu1 }
 0x3e9   : > { %v936_v39 = vadd.f32 %v934_v37, %v929_v36 }
 0x3ea   : > { %v926_v40 = vpop.f32.mrf.mxu1 }
 0x3eb   : > { %v937_v41 = vmax.f32 %v936_v39, 0.0 }
 0x3ec   : > { %v1270_v42 = vpop.f32.mrf.mxu1 }
 0x3ed   : > { %v938_v43 = vsel %vm1431_vm5, %v937_v41, 0.0 }
 0x3ee   : > { %1038 = vrot.lane.b32.xlu0 %v938_v43, %s1315_s23  ;;  %v939_v44 = vpack.c.bf16 %v938_v43, %v938_v43  ;;  %942 = vrot.lane.b32.xlu1 %v938_v43, %s1318_s12 }
 0x3f0   : > { %v996_v46 = vsel %vm576_vm6, %v939_v44, 0 }
 0x3f1   : > { %1278 = vmatpush3.bf16.msra.mxu1 %v996_v46 }
 0x3f2   : > { %1093 = vperm.xlu1 %1303, %v1090_v45  }
 0x3f4   : > { %1280 = vmatmul.mubr.msk.bf16.vlgmr.msra.gmra.mxu1 %vm572_vm7, %v1178_v47 }
 0x460   : > { %v1039_v48 = vpop.permute.xlu0 %1038  ;;  %v943_v49 = vpop.permute.xlu1 %942 }
 0x461   : > { %v944_v50 = vpack.c.bf16 %v943_v49, %v943_v49  ;;  %v1040_v51 = vpack.c.bf16 %v1039_v48, %v1039_v48 }
 0x463   : > { %v950_v52 = vsel %vm576_vm6, %v944_v50, 0  ;;  %v1047_v54 = vsel %vm576_vm6, %v1040_v51, 0 }
 0x464   : > { %1272 = vmatpush3.bf16.msra.mxu0 %v950_v52 }
 0x465   : > { %1283 = vmatprep.subr.bf16.mxu0 %v1313_v0 }
 0x467   : > { %1274 = vmatmul.mubr.msk.bf16.vlgmr.msra.gmra.mxu0 %vm572_vm7, %v945_v53 }
 0x468   : > { %1284 = vmatpush3.bf16.msra.mxu0 %v1047_v54  ;;  %1285 = vmatprep.mubr.msk.bf16.mxu0 %vm1314_vm0, %v1313_v0 }
 0x46d   : > { %v1094_v4 = vpop.permute.xlu1 %1093 }
 0x46f   : > { %1286 = vmatmul.mubr.msk.bf16.vlgmr.msra.gmra.mxu0 %vm572_vm7, %v1181_v55 }
 0x4b4   : > { %v1032_v56 = vpop.f32.mrf.mxu1 }
 0x4b6   : > { %v1281_v57 = vpop.f32.mrf.mxu1 }
 0x4b8   : > { %v1035_v58 = vpop.f32.mrf.mxu1 }
 0x4ba   : > { %v1282_v59 = vpop.f32.mrf.mxu1 }
 0x527   : > { %v986_v60 = vpop.f32.mrf.mxu0 }
 0x528   : > { %v1033_v1 = vadd.f32 %v1032_v56, %v986_v60 }
 0x529   : > { %v1275_v61 = vpop.f32.mrf.mxu0 }
 0x52b   : > { %v989_v62 = vpop.f32.mrf.mxu0 }
 0x52d   : > { %v1276_v63 = vpop.f32.mrf.mxu0 }
 0x52f   : > { %v1083_v2 = vpop.f32.mrf.mxu0 }
 0x530   : > { %v1089_v3 = vadd.f32 %v1083_v2, %v1033_v1 }
 0x531   : > { %v1287_v0 = vpop.f32.mrf.mxu0 }
 0x532   : > { %v1096_v5 = vadd.f32 %v1094_v4, %v1089_v3 }
 0x533   : > { %v1086_v6 = vpop.f32.mrf.mxu0 }
 0x534   : > { %v1097_v7 = vmax.f32 %v1096_v5, 0.0 }
 0x535   : > { %v1288_v8 = vpop.f32.mrf.mxu0 }
 0x536   : > { %v1098_v9 = vadd.f32 %v1097_v7, %v1482_v13 }
 0x538   : > { %v1099_v10 = vmax.f32 %v1098_v9, 0.0 }
 0x53a   : > { %v1100_v11 = vsel %vm1431_vm5, %v1099_v10, 0.0 }
 0x53b   : > { %1101 = vst [vmem:[%s381_s13] sm:$0xff] %v1100_v11 }
 0x53c PF: > { %s21_s17 = sadd.s32 1, %s1311_s17  }
 0x53d   : > { %p18_p4 = scmp.ge.s32.totalorder %s21_s17, 4  }
 0x53f   :  { %20 = sbr.rel (!%p18_p4) target bundleno = 1 (0x1), region = 102 }

</bundles_post_ra>
